<compile_context>
chip_gen: v6e
topology: v6e:2x2x1
jax: 0.10.0
libtpu: 0.0.40
codegen_flags: <defaults>
</compile_context>

<pallas_src>
import numpy as np
import jax
import jax.numpy as jnp
from jax.experimental import pallas as pl
from jax.experimental.pallas import tpu as pltpu

H1 = 512      # first hidden size (per head)
H2 = 256      # second hidden size (per head)
NLOGITS = 9   # action_size * 3 with action_size == 3 (implied by .view(B, 3, 3))
MAX_TB = 512  # max batch-tile rows (activation footprint ~ MAX_TB * 1024 * 4B ≈ 2 MiB)


def actor_critic_kernel(
    x_ref,                       # (TB, S)     f32
    gmat_ref,                    # (9, 9)      f32  block-diagonal ones (group sums)
    w1_ref, b1_ref,              # (S, 1024)   bf16, (1, 1024) f32   fused layer 1
    aw2_ref, ab2_ref,            # (512, 256)  bf16, (1, 256)  f32
    aw3_ref, ab3_ref,            # (256, 9)    bf16, (1, 9)    f32
    cw2_ref, cb2_ref,            # (512, 256)  bf16, (1, 256)  f32
    cw3_ref, cb3_ref,            # (256, 1)    bf16, (1, 1)    f32
    out_ref,                     # (TB, 10)    f32
):
    x = x_ref[...].astype(jnp.bfloat16)

    # ---- fused first layer (actor | critic): one MXU pass over x, one ReLU ----
    xh = jnp.dot(x, w1_ref[...], preferred_element_type=jnp.float32) + b1_ref[...]
    xh = jnp.maximum(xh, 0.0)
    h = xh[:, :H1].astype(jnp.bfloat16)    # actor branch  (lane-aligned slice)
    g = xh[:, H1:].astype(jnp.bfloat16)    # critic branch (lane-aligned slice)

    # ---- actor head ----
    h2 = jnp.dot(h, aw2_ref[...], preferred_element_type=jnp.float32) + ab2_ref[...]
    h2 = jnp.maximum(h2, 0.0).astype(jnp.bfloat16)
    logits = jnp.dot(h2, aw3_ref[...], preferred_element_type=jnp.float32) + ab3_ref[...]

    # ---- critic head ----
    g2 = jnp.dot(g, cw2_ref[...], preferred_element_type=jnp.float32) + cb2_ref[...]
    g2 = jnp.maximum(g2, 0.0).astype(jnp.bfloat16)
    v = jnp.dot(g2, cw3_ref[...], preferred_element_type=jnp.float32) + cb3_ref[...]

    # ---- grouped softmax over groups of 3 lanes (== softmax(dim=2) on (B,3,3)) ----
    # A single per-row max is a per-row constant, so per-group results match the
    # per-group max formulation exactly (it cancels in the ratio).
    m = jnp.max(logits, axis=-1, keepdims=True)
    e = jnp.exp(logits - m)                                        # one EUP pass
    group_sums = jnp.dot(e, gmat_ref[...],
                         preferred_element_type=jnp.float32)       # (TB, 9) via 9x9 matmul
    probs = e * pl.reciprocal(group_sums, approx=False)

    # ---- single merged output tile: lanes 0..8 probs, lane 9 value ----
    out_ref[...] = jnp.concatenate([probs, v], axis=-1)


# Block-diagonal ones matrix for the grouped softmax denominator (built once).
_GROUP_MAT = jnp.asarray(
    np.kron(np.eye(3, dtype=np.float32), np.ones((3, 3), dtype=np.float32))
)


def init_params(key, state_size, action_size=3):
    """Per-layer init matching the PyTorch module's layer shapes.
    Weights stored as (in, out) == transpose of nn.Linear's (out, in)."""
    assert action_size == 3, "forward() views logits as (B, 3, 3) => action_size == 3"

    def linear(k, fan_in, fan_out):
        kw, kb = jax.random.split(k)
        bound = 1.0 / jnp.sqrt(fan_in)
        w = jax.random.uniform(kw, (fan_in, fan_out), jnp.float32, -bound, bound)
        b = jax.random.uniform(kb, (1, fan_out), jnp.float32, -bound, bound)
        return w, b

    keys = jax.random.split(key, 6)
    aw1, ab1 = linear(keys[0], state_size, H1)
    aw2, ab2 = linear(keys[1], H1, H2)
    aw3, ab3 = linear(keys[2], H2, action_size * 3)
    cw1, cb1 = linear(keys[3], state_size, H1)
    cw2, cb2 = linear(keys[4], H1, H2)
    cw3, cb3 = linear(keys[5], H2, 1)
    return dict(aw1=aw1, ab1=ab1, aw2=aw2, ab2=ab2, aw3=aw3, ab3=ab3,
                cw1=cw1, cb1=cb1, cw2=cw2, cb2=cb2, cw3=cw3, cb3=cb3)


def pack_params(p):
    """One-time packing: fuse the two first layers and cast weights to bf16
    (biases stay f32; all elementwise math in the kernel stays f32)."""
    w1 = jnp.concatenate([p["aw1"], p["cw1"]], axis=1).astype(jnp.bfloat16)  # (S, 1024)
    b1 = jnp.concatenate([p["ab1"], p["cb1"]], axis=1)                        # (1, 1024) f32
    return dict(
        w1=w1, b1=b1,
        aw2=p["aw2"].astype(jnp.bfloat16), ab2=p["ab2"],
        aw3=p["aw3"].astype(jnp.bfloat16), ab3=p["ab3"],
        cw2=p["cw2"].astype(jnp.bfloat16), cb2=p["cb2"],
        cw3=p["cw3"].astype(jnp.bfloat16), cb3=p["cb3"],
    )


def _round_up(n, m):
    return ((n + m - 1) // m) * m


@jax.jit
def actor_critic_forward(state, kp):
    """state: (B, S) or (S,) float32. Returns (action_probs (B,3,3), state_value (B,1))."""
    if state.ndim == 1:
        state = state[None, :]
    B, S = state.shape

    # Batch tiling: minimize padding, cap per-tile VMEM activation footprint.
    ntiles = max(1, -(-B // MAX_TB))          # cdiv
    TB = _round_up(-(-B // ntiles), 8)        # sublane-aligned tile rows
    B_pad = ntiles * TB
    if B_pad != B:
        state = jnp.pad(state, ((0, B_pad - B), (0, 0)))

    args = (
        state, _GROUP_MAT,
        kp["w1"], kp["b1"],
        kp["aw2"], kp["ab2"], kp["aw3"], kp["ab3"],
        kp["cw2"], kp["cb2"], kp["cw3"], kp["cb3"],
    )

    # Weights: full-array blocks with constant index maps -> stay resident in
    # VMEM across batch tiles (no re-fetch).  State/output tiles pipeline.
    def full_spec(a):
        return pl.BlockSpec(a.shape, lambda i: (0,) * a.ndim)

    in_specs = [pl.BlockSpec((TB, S), lambda i: (i, 0))] + [full_spec(a) for a in args[1:]]
    out_specs = pl.BlockSpec((TB, NLOGITS + 1), lambda i: (i, 0))

    out = pl.pallas_call(
        actor_critic_kernel,
        out_shape=jax.ShapeDtypeStruct((B_pad, NLOGITS + 1), jnp.float32),
        grid_spec=pltpu.PrefetchScalarGridSpec(
            num_scalar_prefetch=0,
            grid=(ntiles,),
            in_specs=in_specs,
            out_specs=out_specs,
        ),
        compiler_params=pltpu.CompilerParams(
            dimension_semantics=("parallel",),   # batch tiles are independent
        ),
    )(*args)

    out = out[:B]
    action_probs = out[:, :NLOGITS].reshape(B, 3, 3)
    state_value = out[:, NLOGITS:NLOGITS + 1]
    return action_probs, state_value


def _reference_forward(state, kp):
    """Pure-JAX f32 reference using the same (bf16-stored) weights."""
    if state.ndim == 1:
        state = state[None, :]
    B = state.shape[0]
    xh = jnp.maximum(state @ kp["w1"].astype(jnp.float32) + kp["b1"], 0.0)
    h, g = xh[:, :H1], xh[:, H1:]
    h = jnp.maximum(h @ kp["aw2"].astype(jnp.float32) + kp["ab2"], 0.0)
    logits = h @ kp["aw3"].astype(jnp.float32) + kp["ab3"]
    probs = jax.nn.softmax(logits.reshape(B, 3, 3), axis=2)
    g = jnp.maximum(g @ kp["cw2"].astype(jnp.float32) + kp["cb2"], 0.0)
    v = g @ kp["cw3"].astype(jnp.float32) + kp["cb3"]
    return probs, v


if __name__ == "__main__":
    state_size = 32
    action_size = 3

    key = jax.random.PRNGKey(0)
    kparam, kstate = jax.random.split(key)
    params = pack_params(init_params(kparam, state_size, action_size))

    # ---- small sublane-aligned batch ----
    batch = 8
    state = jax.random.normal(kstate, (batch, state_size), jnp.float32)
    probs, value = actor_critic_forward(state, params)
    probs = jax.block_until_ready(probs)
    value = jax.block_until_ready(value)

    ref_probs, ref_value = _reference_forward(state, params)
    assert probs.shape == (batch, 3, 3)
    assert value.shape == (batch, 1)
    # bf16 MXU inputs vs f32 reference -> relaxed tolerance
    assert jnp.allclose(probs, ref_probs, atol=2e-2, rtol=2e-2)
    assert jnp.allclose(value, ref_value, atol=2e-2, rtol=2e-2)
    assert jnp.allclose(jnp.sum(probs, axis=-1), 1.0, atol=1e-3)

    # ---- unaligned batch (exercises sublane padding in the wrapper) ----
    batch_u = 3
    state_u = jax.random.normal(jax.random.PRNGKey(1), (batch_u, state_size), jnp.float32)
    pu, vu = actor_critic_forward(state_u, params)
    pu = jax.block_until_ready(pu)
    rpu, rvu = _reference_forward(state_u, params)
    assert pu.shape == (batch_u, 3, 3) and vu.shape == (batch_u, 1)
    assert jnp.allclose(pu, rpu, atol=2e-2, rtol=2e-2)
    assert jnp.allclose(vu, rvu, atol=2e-2, rtol=2e-2)

    # ---- multi-tile batch (exercises the batch grid / resident weights) ----
    batch_l = 600  # -> 2 tiles of 304 rows
    state_l = jax.random.normal(jax.random.PRNGKey(2), (batch_l, state_size), jnp.float32)
    plg, vlg = actor_critic_forward(state_l, params)
    plg = jax.block_until_ready(plg)
    rpl, rvl = _reference_forward(state_l, params)
    assert plg.shape == (batch_l, 3, 3) and vlg.shape == (batch_l, 1)
    assert jnp.allclose(plg, rpl, atol=2e-2, rtol=2e-2)
    assert jnp.allclose(vlg, rvl, atol=2e-2, rtol=2e-2)

    # ---- 1-D state path (unsqueeze in forward) ----
    p1, v1 = actor_critic_forward(state[0], params)
    p1 = jax.block_until_ready(p1)
    v1 = jax.block_until_ready(v1)
    assert p1.shape == (1, 3, 3) and v1.shape == (1, 1)
    assert jnp.allclose(p1[0], probs[0], atol=2e-2, rtol=2e-2)

    print("KERNEL_OK")
</pallas_src>

<mosaic_0001>
module attributes {stable_mosaic.version = 11 : i64} {
  func.func @actor_critic_kernel(%arg0: i32, %arg1: memref<8x32xf32, #tpu.memory_space<vmem>>, %arg2: memref<9x9xf32, #tpu.memory_space<vmem>>, %arg3: memref<32x1024xbf16, #tpu.memory_space<vmem>>, %arg4: memref<1x1024xf32, #tpu.memory_space<vmem>>, %arg5: memref<512x256xbf16, #tpu.memory_space<vmem>>, %arg6: memref<1x256xf32, #tpu.memory_space<vmem>>, %arg7: memref<256x9xbf16, #tpu.memory_space<vmem>>, %arg8: memref<1x9xf32, #tpu.memory_space<vmem>>, %arg9: memref<512x256xbf16, #tpu.memory_space<vmem>>, %arg10: memref<1x256xf32, #tpu.memory_space<vmem>>, %arg11: memref<256x1xbf16, #tpu.memory_space<vmem>>, %arg12: memref<1x1xf32, #tpu.memory_space<vmem>>, %arg13: memref<8x10xf32, #tpu.memory_space<vmem>>) attributes {dimension_semantics = [#tpu.dimension_semantics<parallel>], iteration_bounds = array<i64: 1>, scalar_prefetch = 0 : i64, scratch_operands = 0 : i64, tpu.core_type = #tpu.core_type<tc>, window_params = [{transform_indices = @transform_0, window_bounds = array<i64: 8, 32>}, {pipeline_mode = #tpu.pipeline_mode<synchronous>, transform_indices = @transform_1, window_bounds = array<i64: 9, 9>}, {pipeline_mode = #tpu.pipeline_mode<synchronous>, transform_indices = @transform_2, window_bounds = array<i64: 32, 1024>}, {pipeline_mode = #tpu.pipeline_mode<synchronous>, transform_indices = @transform_3, window_bounds = array<i64: 1, 1024>}, {pipeline_mode = #tpu.pipeline_mode<synchronous>, transform_indices = @transform_4, window_bounds = array<i64: 512, 256>}, {pipeline_mode = #tpu.pipeline_mode<synchronous>, transform_indices = @transform_5, window_bounds = array<i64: 1, 256>}, {pipeline_mode = #tpu.pipeline_mode<synchronous>, transform_indices = @transform_6, window_bounds = array<i64: 256, 9>}, {pipeline_mode = #tpu.pipeline_mode<synchronous>, transform_indices = @transform_7, window_bounds = array<i64: 1, 9>}, {pipeline_mode = #tpu.pipeline_mode<synchronous>, transform_indices = @transform_8, window_bounds = array<i64: 512, 256>}, {pipeline_mode = #tpu.pipeline_mode<synchronous>, transform_indices = @transform_9, window_bounds = array<i64: 1, 256>}, {pipeline_mode = #tpu.pipeline_mode<synchronous>, transform_indices = @transform_10, window_bounds = array<i64: 256, 1>}, {pipeline_mode = #tpu.pipeline_mode<synchronous>, transform_indices = @transform_11, window_bounds = array<i64: 1, 1>}, {transform_indices = @transform_12, window_bounds = array<i64: 8, 10>}]} {
    %c0 = arith.constant 0 : index
    %c0_0 = arith.constant 0 : index
    %0 = vector.load %arg1[%c0, %c0_0] : memref<8x32xf32, #tpu.memory_space<vmem>>, vector<8x32xf32>
    %1 = arith.truncf %0 : vector<8x32xf32> to vector<8x32xbf16>
    %c0_1 = arith.constant 0 : index
    %c0_2 = arith.constant 0 : index
    %2 = vector.load %arg3[%c0_1, %c0_2] : memref<32x1024xbf16, #tpu.memory_space<vmem>>, vector<32x1024xbf16>
    %cst = arith.constant dense<0.000000e+00> : vector<8x1024xf32>
    %3 = tpu.matmul %1, %2, %cst {dimension_numbers = #tpu.dot_dimension_numbers<[1], [0], [0], [1], [0, 0, 1, 1], [], []>} : vector<8x32xbf16>, vector<32x1024xbf16>, vector<8x1024xf32> -> vector<8x1024xf32>
    %c0_3 = arith.constant 0 : index
    %c0_4 = arith.constant 0 : index
    %4 = vector.load %arg4[%c0_3, %c0_4] : memref<1x1024xf32, #tpu.memory_space<vmem>>, vector<1x1024xf32>
    %5 = vector.broadcast %4 : vector<1x1024xf32> to vector<8x1024xf32>
    %6 = arith.addf %3, %5 : vector<8x1024xf32>
    %cst_5 = arith.constant 0.000000e+00 : f32
    %7 = vector.broadcast %cst_5 : f32 to vector<8x1024xf32>
    %8 = arith.maximumf %6, %7 : vector<8x1024xf32>
    %9 = vector.extract_strided_slice %8 {offsets = [0, 0], sizes = [8, 512], strides = [1, 1]} : vector<8x1024xf32> to vector<8x512xf32>
    %10 = arith.truncf %9 : vector<8x512xf32> to vector<8x512xbf16>
    %11 = vector.extract_strided_slice %8 {offsets = [0, 512], sizes = [8, 512], strides = [1, 1]} : vector<8x1024xf32> to vector<8x512xf32>
    %12 = arith.truncf %11 : vector<8x512xf32> to vector<8x512xbf16>
    %c0_6 = arith.constant 0 : index
    %c0_7 = arith.constant 0 : index
    %13 = vector.load %arg5[%c0_6, %c0_7] : memref<512x256xbf16, #tpu.memory_space<vmem>>, vector<512x256xbf16>
    %cst_8 = arith.constant dense<0.000000e+00> : vector<8x256xf32>
    %14 = tpu.matmul %10, %13, %cst_8 {dimension_numbers = #tpu.dot_dimension_numbers<[1], [0], [0], [1], [0, 0, 1, 1], [], []>} : vector<8x512xbf16>, vector<512x256xbf16>, vector<8x256xf32> -> vector<8x256xf32>
    %c0_9 = arith.constant 0 : index
    %c0_10 = arith.constant 0 : index
    %15 = vector.load %arg6[%c0_9, %c0_10] : memref<1x256xf32, #tpu.memory_space<vmem>>, vector<1x256xf32>
    %16 = vector.broadcast %15 : vector<1x256xf32> to vector<8x256xf32>
    %17 = arith.addf %14, %16 : vector<8x256xf32>
    %cst_11 = arith.constant 0.000000e+00 : f32
    %18 = vector.broadcast %cst_11 : f32 to vector<8x256xf32>
    %19 = arith.maximumf %17, %18 : vector<8x256xf32>
    %20 = arith.truncf %19 : vector<8x256xf32> to vector<8x256xbf16>
    %c0_12 = arith.constant 0 : index
    %c0_13 = arith.constant 0 : index
    %21 = vector.load %arg7[%c0_12, %c0_13] : memref<256x9xbf16, #tpu.memory_space<vmem>>, vector<256x9xbf16>
    %cst_14 = arith.constant dense<0.000000e+00> : vector<8x9xf32>
    %22 = tpu.matmul %20, %21, %cst_14 {dimension_numbers = #tpu.dot_dimension_numbers<[1], [0], [0], [1], [0, 0, 1, 1], [], []>} : vector<8x256xbf16>, vector<256x9xbf16>, vector<8x9xf32> -> vector<8x9xf32>
    %c0_15 = arith.constant 0 : index
    %c0_16 = arith.constant 0 : index
    %23 = vector.load %arg8[%c0_15, %c0_16] : memref<1x9xf32, #tpu.memory_space<vmem>>, vector<1x9xf32>
    %24 = vector.broadcast %23 : vector<1x9xf32> to vector<8x9xf32>
    %25 = arith.addf %22, %24 : vector<8x9xf32>
    %c0_17 = arith.constant 0 : index
    %c0_18 = arith.constant 0 : index
    %26 = vector.load %arg9[%c0_17, %c0_18] : memref<512x256xbf16, #tpu.memory_space<vmem>>, vector<512x256xbf16>
    %cst_19 = arith.constant dense<0.000000e+00> : vector<8x256xf32>
    %27 = tpu.matmul %12, %26, %cst_19 {dimension_numbers = #tpu.dot_dimension_numbers<[1], [0], [0], [1], [0, 0, 1, 1], [], []>} : vector<8x512xbf16>, vector<512x256xbf16>, vector<8x256xf32> -> vector<8x256xf32>
    %c0_20 = arith.constant 0 : index
    %c0_21 = arith.constant 0 : index
    %28 = vector.load %arg10[%c0_20, %c0_21] : memref<1x256xf32, #tpu.memory_space<vmem>>, vector<1x256xf32>
    %29 = vector.broadcast %28 : vector<1x256xf32> to vector<8x256xf32>
    %30 = arith.addf %27, %29 : vector<8x256xf32>
    %cst_22 = arith.constant 0.000000e+00 : f32
    %31 = vector.broadcast %cst_22 : f32 to vector<8x256xf32>
    %32 = arith.maximumf %30, %31 : vector<8x256xf32>
    %33 = arith.truncf %32 : vector<8x256xf32> to vector<8x256xbf16>
    %c0_23 = arith.constant 0 : index
    %c0_24 = arith.constant 0 : index
    %34 = vector.load %arg11[%c0_23, %c0_24] : memref<256x1xbf16, #tpu.memory_space<vmem>>, vector<256x1xbf16>
    %cst_25 = arith.constant dense<0.000000e+00> : vector<8x1xf32>
    %35 = tpu.matmul %33, %34, %cst_25 {dimension_numbers = #tpu.dot_dimension_numbers<[1], [0], [0], [1], [0, 0, 1, 1], [], []>} : vector<8x256xbf16>, vector<256x1xbf16>, vector<8x1xf32> -> vector<8x1xf32>
    %c0_26 = arith.constant 0 : index
    %c0_27 = arith.constant 0 : index
    %36 = vector.load %arg12[%c0_26, %c0_27] : memref<1x1xf32, #tpu.memory_space<vmem>>, vector<1x1xf32>
    %37 = vector.broadcast %36 : vector<1x1xf32> to vector<8x1xf32>
    %38 = arith.addf %35, %37 : vector<8x1xf32>
    %cst_28 = arith.constant dense<0xFF800000> : vector<8xf32>
    %39 = vector.multi_reduction <maximumf>, %25, %cst_28 [1] : vector<8x9xf32> to vector<8xf32>
    %40 = vector.shape_cast %39 : vector<8xf32> to vector<8x1xf32>
    %41 = vector.broadcast %40 : vector<8x1xf32> to vector<8x9xf32>
    %42 = arith.subf %25, %41 : vector<8x9xf32>
    %43 = math.exp %42 : vector<8x9xf32>
    %c0_29 = arith.constant 0 : index
    %c0_30 = arith.constant 0 : index
    %44 = vector.load %arg2[%c0_29, %c0_30] : memref<9x9xf32, #tpu.memory_space<vmem>>, vector<9x9xf32>
    %cst_31 = arith.constant dense<0.000000e+00> : vector<8x9xf32>
    %45 = tpu.matmul %43, %44, %cst_31 {dimension_numbers = #tpu.dot_dimension_numbers<[1], [0], [0], [1], [0, 0, 1, 1], [], []>} : vector<8x9xf32>, vector<9x9xf32>, vector<8x9xf32> -> vector<8x9xf32>
    %46 = tpu.reciprocal %45 : vector<8x9xf32> -> vector<8x9xf32>
    %47 = arith.mulf %43, %46 : vector<8x9xf32>
    %48 = tpu.concatenate %47, %38 in 1 : vector<8x9xf32>, vector<8x1xf32> -> vector<8x10xf32>
    %c0_32 = arith.constant 0 : index
    %c0_33 = arith.constant 0 : index
    %49 = vector.load %arg13[%c0_32, %c0_33] : memref<8x10xf32, #tpu.memory_space<vmem>>, vector<8x10xf32>
    tpu.vector_store %arg13[%c0_32, %c0_33], %48 {strides = array<i32>} : memref<8x10xf32, #tpu.memory_space<vmem>>, vector<8x10xf32>,
    return
  }
  func.func @transform_0(%arg0: i32) -> (i32, i32) {
    %c0_i32 = arith.constant 0 : i32
    %c0_i32_0 = arith.constant 0 : i32
    return %arg0, %c0_i32 : i32, i32
  }
  func.func @transform_1(%arg0: i32) -> (i32, i32) {
    %c0_i32 = arith.constant 0 : i32
    %c0_i32_0 = arith.constant 0 : i32
    %c0_i32_1 = arith.constant 0 : i32
    return %c0_i32, %c0_i32_0 : i32, i32
  }
  func.func @transform_2(%arg0: i32) -> (i32, i32) {
    %c0_i32 = arith.constant 0 : i32
    %c0_i32_0 = arith.constant 0 : i32
    %c0_i32_1 = arith.constant 0 : i32
    return %c0_i32, %c0_i32_0 : i32, i32
  }
  func.func @transform_3(%arg0: i32) -> (i32, i32) {
    %c0_i32 = arith.constant 0 : i32
    %c0_i32_0 = arith.constant 0 : i32
    %c0_i32_1 = arith.constant 0 : i32
    return %c0_i32, %c0_i32_0 : i32, i32
  }
  func.func @transform_4(%arg0: i32) -> (i32, i32) {
    %c0_i32 = arith.constant 0 : i32
    %c0_i32_0 = arith.constant 0 : i32
    %c0_i32_1 = arith.constant 0 : i32
    return %c0_i32, %c0_i32_0 : i32, i32
  }
  func.func @transform_5(%arg0: i32) -> (i32, i32) {
    %c0_i32 = arith.constant 0 : i32
    %c0_i32_0 = arith.constant 0 : i32
    %c0_i32_1 = arith.constant 0 : i32
    return %c0_i32, %c0_i32_0 : i32, i32
  }
  func.func @transform_6(%arg0: i32) -> (i32, i32) {
    %c0_i32 = arith.constant 0 : i32
    %c0_i32_0 = arith.constant 0 : i32
    %c0_i32_1 = arith.constant 0 : i32
    return %c0_i32, %c0_i32_0 : i32, i32
  }
  func.func @transform_7(%arg0: i32) -> (i32, i32) {
    %c0_i32 = arith.constant 0 : i32
    %c0_i32_0 = arith.constant 0 : i32
    %c0_i32_1 = arith.constant 0 : i32
    return %c0_i32, %c0_i32_0 : i32, i32
  }
  func.func @transform_8(%arg0: i32) -> (i32, i32) {
    %c0_i32 = arith.constant 0 : i32
    %c0_i32_0 = arith.constant 0 : i32
    %c0_i32_1 = arith.constant 0 : i32
    return %c0_i32, %c0_i32_0 : i32, i32
  }
  func.func @transform_9(%arg0: i32) -> (i32, i32) {
    %c0_i32 = arith.constant 0 : i32
    %c0_i32_0 = arith.constant 0 : i32
    %c0_i32_1 = arith.constant 0 : i32
    return %c0_i32, %c0_i32_0 : i32, i32
  }
  func.func @transform_10(%arg0: i32) -> (i32, i32) {
    %c0_i32 = arith.constant 0 : i32
    %c0_i32_0 = arith.constant 0 : i32
    %c0_i32_1 = arith.constant 0 : i32
    return %c0_i32, %c0_i32_0 : i32, i32
  }
  func.func @transform_11(%arg0: i32) -> (i32, i32) {
    %c0_i32 = arith.constant 0 : i32
    %c0_i32_0 = arith.constant 0 : i32
    %c0_i32_1 = arith.constant 0 : i32
    return %c0_i32, %c0_i32_0 : i32, i32
  }
  func.func @transform_12(%arg0: i32) -> (i32, i32) {
    %c0_i32 = arith.constant 0 : i32
    %c0_i32_0 = arith.constant 0 : i32
    return %arg0, %c0_i32 : i32, i32
  }
}

</mosaic_0001>

<bundles_post_ra>
// kernel: actor_critic_forward.1
= control target key start
LH: loop header
LB: loop body
LE: loop exit
PB: predicated region body
PF: predicated region fallthrough
CT: control target
= control target key end

     0   :  { %s2631_s0 = inlined_call_operand.vmem [shape: f32[8,32], index: 0, kind: input, shape index: {}]   ;;  %s2632_s1 = inlined_call_operand.vmem [shape: f32[9,9], index: 1, kind: input, shape index: {}]   ;;  %s2633_s2 = inlined_call_operand.vmem [shape: bf16[32,1024], index: 2, kind: input, shape index: {}]   ;;  %s2634_s3 = inlined_call_operand.vmem [shape: f32[1,1024], index: 3, kind: input, shape index: {}]   ;;  %s2635_s4 = inlined_call_operand.hbm [shape: bf16[512,256], index: 4, kind: input, shape index: {}]   ;;  %s2636_s5 = inlined_call_operand.vmem [shape: f32[1,256], index: 5, kind: input, shape index: {}]   ;;  %s2637_s6 = inlined_call_operand.vmem [shape: bf16[256,9], index: 6, kind: input, shape index: {}]   ;;  %s2638_s7 = inlined_call_operand.vmem [shape: f32[1,9], index: 7, kind: input, shape index: {}]   ;;  %s2639_s8 = inlined_call_operand.hbm [shape: bf16[512,256], index: 8, kind: input, shape index: {}]   ;;  %s2640_s9 = inlined_call_operand.vmem [shape: f32[1,256], index: 9, kind: input, shape index: {}]   ;;  %s2641_s10 = inlined_call_operand.vmem [shape: bf16[256,1], index: 10, kind: input, shape index: {}]   ;;  %s2642_s11 = inlined_call_operand.<no memory space> [shape: f32[1,1], index: 11, kind: input, shape index: {}]   ;;  %s2643_s12 = inlined_call_operand.vmem [shape: f32[8,10], index: 12, kind: output, shape index: {}]  }
   0x1   :  { %v17_v0 = vstv %s2642_s11 }
   0x2   :  { %18 = vst [vmem:[#allocation2] sm:$0x1] %v17_v0 }
   0x3   :  { %19 = vsyncpa [#allocation4], 0 }
   0x4   :  { %20 = vsyncpa [#allocation6], 0  ;;  %s2329_s23 = smov [#allocation3]  }
   0x5   :  { %s34_s24 = sshll.u32 %s2329_s23, 4  ;;  %s35_s24 = int_to_ptr.vmem [resolvable:$true] %s34_s24 }
   0x6   :  { %s2293_s25 = scalar_lea.vmem %s35_s24, 8192  ;;  %p2298_p1 = scmp.lt.s32.totalorder %s35_s24, %s35_s24 }
   0x7   :  { %p2294_p0 = scmp.ne.s32.totalorder %s35_s24, %s2293_s25  ;;  %p2299_p2 = scmp.lt.s32.totalorder %s2293_s25, %s2293_s25 }
   0x9   :  { %p2300_p3 = por %p2299_p2, %p2298_p1 }
   0xb   :  { %p2301_p4 = pnand %p2300_p3, %p2294_p0 }
   0xd   :  { %2304 = shalt.err (!%p2301_p4)
}
   0xe   :  { %s2330_s26 = smov 128   ;;  %s2331_s27 = smov 8  }
   0xf   :  { %40 = dma.hbm_to_vmem [thread:$0]  %s2635_s4, 8192, %s35_s24, [#allocation4], %s2330_s26, %s2330_s26, %s2331_s27  }
  0x10   :  { %s2332_s11 = smov [#allocation5]  }
  0x11   :  { %s52_s30 = sshll.u32 %s2332_s11, 4  ;;  %s53_s30 = int_to_ptr.vmem [resolvable:$true] %s52_s30 }
  0x12   :  { %s2313_s13 = scalar_lea.vmem %s53_s30, 8192  ;;  %p2318_p6 = scmp.lt.s32.totalorder %s53_s30, %s53_s30 }
  0x13   :  { %p2314_p5 = scmp.ne.s32.totalorder %s53_s30, %s2313_s13  ;;  %p2319_p7 = scmp.lt.s32.totalorder %s2313_s13, %s2313_s13 }
  0x15   :  { %p2320_p8 = por %p2319_p7, %p2318_p6 }
  0x17   :  { %p2321_p9 = pnand %p2320_p8, %p2314_p5 }
  0x19   :  { %2324 = shalt.err (!%p2321_p9)
}
  0x1a   :  { %58 = dma.hbm_to_vmem [thread:$0]  %s2639_s8, 8192, %s53_s30, [#allocation6], %s2330_s26, %s2330_s26, %s2331_s27  }
  0x1b   :  { %2325 = dma.done.wait [#allocation4], 8192  }
  0x1c   :  { %2326 = vsyncadd [#allocation4], 4294959104 }
  0x1d   :  { %2327 = dma.done.wait [#allocation6], 8192  }
  0x1e   :  { %2328 = vsyncadd [#allocation6], 4294959104  ;;  %v2333_v1 = vmov 0   ;;  %v82_v2 = vld [vmem:[%s2633_s2 + $0x40] sm:$0xff]  ;;  %v83_v4 = vld [vmem:[%s2633_s2 + $0x48] sm:$0xff]  ;;  %vm212_vm0 = vcmask 261120  }
  0x1f   :  { %248 = vmatprep.mubr.bf16.mxu0 %v2333_v1  ;;  %289 = vmatprep.mubr.bf16.mxu1 %v2333_v1  ;;  %v86_v3 = vld [vmem:[%s2633_s2 + $0x60] sm:$0xff]  ;;  %v87_v6 = vld [vmem:[%s2633_s2 + $0x68] sm:$0xff]  ;;  %v84_v16 = vld [vmem:[%s2633_s2 + $0x50] sm:$0xff]  ;;  %vm1710_vm1 = vcmask 72704   ;;  %vm1722_vm2 = vcmask 1040384   ;;  %vm2335_vm3 = vmmov 0  }
  0x20   :  { %v1820_v5 = vcombine.high %v82_v2, %v86_v3  ;;  %v1819_v7 = vcombine.low %v82_v2, %v86_v3  ;;  %v74_v8 = vld [vmem:[%s2633_s2] sm:$0xff]  ;;  %v1822_v10 = vcombine.high %v83_v4, %v87_v6  ;;  %v1821_v11 = vcombine.low %v83_v4, %v87_v6  ;;  %v75_v13 = vld [vmem:[%s2633_s2 + $0x8] sm:$0xff]  ;;  %v88_v17 = vld [vmem:[%s2633_s2 + $0x70] sm:$0xff] }
  0x21   :  { %v78_v9 = vld [vmem:[%s2633_s2 + $0x20] sm:$0xff]  ;;  %v79_v14 = vld [vmem:[%s2633_s2 + $0x28] sm:$0xff]  ;;  %v85_v20 = vld [vmem:[%s2633_s2 + $0x58] sm:$0xff]  ;;  %v1824_v23 = vcombine.high %v84_v16, %v88_v17  ;;  %v1823_v30 = vcombine.low %v84_v16, %v88_v17  ;;  %vm1803_vm4 = vcmask 80896  }
  0x22   :  { %v1812_v12 = vcombine.high %v74_v8, %v78_v9  ;;  %228 = vmatprep.subr.bf16.mxu0 %v1820_v5  ;;  %v1814_v15 = vcombine.high %v75_v13, %v79_v14  ;;  %269 = vmatprep.subr.bf16.mxu1 %v1822_v10  ;;  %v1811_v18 = vcombine.low %v74_v8, %v78_v9  ;;  %v72_v19 = vld [vmem:[%s2631_s0] sm:$0xff]  ;;  %v89_v21 = vld [vmem:[%s2633_s2 + $0x78] sm:$0xff]  ;;  %v76_v24 = vld [vmem:[%s2633_s2 + $0x10] sm:$0xff] }
  0x23   :  { %229 = vmatpush1.bf16.msra.mxu0 %v1819_v7  ;;  %270 = vmatpush1.bf16.msra.mxu1 %v1821_v11  ;;  %v1813_v22 = vcombine.low %v75_v13, %v79_v14  ;;  %v80_v25 = vld [vmem:[%s2633_s2 + $0x30] sm:$0xff]  ;;  %v1826_v26 = vcombine.high %v85_v20, %v89_v21  ;;  %v77_v27 = vld [vmem:[%s2633_s2 + $0x18] sm:$0xff]  ;;  %v73_v28 = vpack.c.bf16 %v72_v19, %v72_v19  ;;  %v2063_v42 = vld [vmem:[#allocation3 + $0x60] ss:$8 sps:$4 sm:$0xff]  }
  0x24   :  { %230 = vmatprep.subr.bf16.mxu0 %v1812_v12  ;;  %271 = vmatprep.subr.bf16.mxu1 %v1814_v15  ;;  %v81_v29 = vld [vmem:[%s2633_s2 + $0x38] sm:$0xff]  ;;  %v1816_v31 = vcombine.high %v76_v24, %v80_v25  ;;  %v1825_v32 = vcombine.low %v85_v20, %v89_v21  ;;  %v1815_v34 = vcombine.low %v76_v24, %v80_v25  ;;  %v2065_v40 = vld [vmem:[#allocation3 + $0x64] ss:$8 sps:$4 sm:$0xff]   ;;  %v2066_v43 = vld [vmem:[#allocation3 + $0x160] ss:$8 sps:$4 sm:$0xff]  }
  0x25   :  { %v1818_v33 = vcombine.high %v77_v27, %v81_v29  ;;  %v1817_v35 = vcombine.low %v77_v27, %v81_v29  ;;  %v2059_v36 = vld [vmem:[#allocation3 + $0x74] ss:$8 sps:$4 sm:$0xff]   ;;  %v2057_v38 = vld [vmem:[#allocation3 + $0x70] ss:$8 sps:$4 sm:$0xff]   ;;  %v2068_v41 = vld [vmem:[#allocation3 + $0x164] ss:$8 sps:$4 sm:$0xff]  }
  0x26   :  { %v2062_v37 = vld [vmem:[#allocation3 + $0x174] ss:$8 sps:$4 sm:$0xff]   ;;  %v2060_v39 = vld [vmem:[#allocation3 + $0x170] ss:$8 sps:$4 sm:$0xff]   ;;  %v2077_v48 = vld [vmem:[#allocation3 + $0x44] ss:$8 sps:$4 sm:$0xff]  }
  0x27   :  { %231 = vmatpush1.bf16.msra.mxu0 %v1811_v18  ;;  %272 = vmatpush1.bf16.msra.mxu1 %v1813_v22  ;;  %v2071_v44 = vld [vmem:[#allocation3 + $0x54] ss:$8 sps:$4 sm:$0xff]   ;;  %v2069_v46 = vld [vmem:[#allocation3 + $0x50] ss:$8 sps:$4 sm:$0xff]   ;;  %v2080_v49 = vld [vmem:[#allocation3 + $0x144] ss:$8 sps:$4 sm:$0xff]  }
  0x28   :  { %310 = vmatprep.subr.bf16.mxu0 %v1824_v23  ;;  %351 = vmatprep.subr.bf16.mxu1 %v1826_v26  ;;  %v2074_v45 = vld [vmem:[#allocation3 + $0x154] ss:$8 sps:$4 sm:$0xff]   ;;  %v2072_v47 = vld [vmem:[#allocation3 + $0x150] ss:$8 sps:$4 sm:$0xff]   ;;  %v2075_v50 = vld [vmem:[#allocation3 + $0x40] ss:$8 sps:$4 sm:$0xff]  }
  0x29   :  { %v2078_v51 = vld [vmem:[#allocation3 + $0x140] ss:$8 sps:$4 sm:$0xff]   ;;  %v2083_v52 = vld [vmem:[#allocation3 + $0x34] ss:$8 sps:$4 sm:$0xff]   ;;  %v2081_v54 = vld [vmem:[#allocation3 + $0x30] ss:$8 sps:$4 sm:$0xff]  }
  0x2a   :  { %1827 = vmatmul.mubr.msk.bf16.vlgmr.msra.gmra.mxu0 %vm212_vm0, %v73_v28  ;;  %1828 = vmatmul.mubr.msk.bf16.vlgmr.msra.gmra.mxu1 %vm212_vm0, %v73_v28  ;;  %v2086_v53 = vld [vmem:[#allocation3 + $0x134] ss:$8 sps:$4 sm:$0xff]   ;;  %v2084_v55 = vld [vmem:[#allocation3 + $0x130] ss:$8 sps:$4 sm:$0xff]   ;;  %v2089_v56 = vld [vmem:[#allocation3 + $0x24] ss:$8 sps:$4 sm:$0xff]  }
  0x2b   :  { %311 = vmatpush1.bf16.msra.mxu0 %v1823_v30  ;;  %352 = vmatpush1.bf16.msra.mxu1 %v1825_v32  ;;  %v2092_v57 = vld [vmem:[#allocation3 + $0x124] ss:$8 sps:$4 sm:$0xff]   ;;  %v2087_v58 = vld [vmem:[#allocation3 + $0x20] ss:$8 sps:$4 sm:$0xff]   ;;  %v2095_v60 = vld [vmem:[#allocation3 + $0x14] ss:$8 sps:$4 sm:$0xff]  }
  0x2c   :  { %312 = vmatprep.subr.bf16.mxu0 %v1816_v31  ;;  %330 = vmatprep.mubr.bf16.mxu0 %v2333_v1  ;;  %v2090_v59 = vld [vmem:[#allocation3 + $0x120] ss:$8 sps:$4 sm:$0xff]   ;;  %v2098_v61 = vld [vmem:[#allocation3 + $0x114] ss:$8 sps:$4 sm:$0xff]   ;;  %v2093_v62 = vld [vmem:[#allocation3 + $0x10] ss:$8 sps:$4 sm:$0xff]  }
  0x2d   :  { %353 = vmatprep.subr.bf16.mxu1 %v1818_v33  ;;  %371 = vmatprep.mubr.bf16.mxu1 %v2333_v1  ;;  %v2096_v63 = vld [vmem:[#allocation3 + $0x110] ss:$8 sps:$4 sm:$0xff]   ;;  %v2101_v0 = vld [vmem:[#allocation3 + $0x4] ss:$8 sps:$4 sm:$0xff]   ;;  %v2099_v1 = vld [vmem:[#allocation3] ss:$8 sps:$4 sm:$0xff]  }
  0x2e   :  { %v2104_v2 = vld [vmem:[#allocation3 + $0x104] ss:$8 sps:$4 sm:$0xff]   ;;  %v2102_v3 = vld [vmem:[#allocation3 + $0x100] ss:$8 sps:$4 sm:$0xff]   ;;  %v2107_v4 = vld [vmem:[#allocation3 + $0xf4] ss:$8 sps:$4 sm:$0xff]  }
  0x2f   :  { %313 = vmatpush1.bf16.msra.mxu0 %v1815_v34  ;;  %354 = vmatpush1.bf16.msra.mxu1 %v1817_v35  ;;  %v2110_v5 = vld [vmem:[#allocation3 + $0x1f4] ss:$8 sps:$4 sm:$0xff]   ;;  %v2105_v6 = vld [vmem:[#allocation3 + $0xf0] ss:$8 sps:$4 sm:$0xff]   ;;  %v2113_v8 = vld [vmem:[#allocation3 + $0xe4] ss:$8 sps:$4 sm:$0xff]  }
  0x30   :  { %792 = vmatprep.subr.bf16.mxu0 %v2059_v36  ;;  %833 = vmatprep.subr.bf16.mxu1 %v2062_v37  ;;  %v2108_v7 = vld [vmem:[#allocation3 + $0x1f0] ss:$8 sps:$4 sm:$0xff]   ;;  %v2116_v9 = vld [vmem:[#allocation3 + $0x1e4] ss:$8 sps:$4 sm:$0xff]   ;;  %v2111_v10 = vld [vmem:[#allocation3 + $0xe0] ss:$8 sps:$4 sm:$0xff]  }
  0x31   :  { %v2114_v11 = vld [vmem:[#allocation3 + $0x1e0] ss:$8 sps:$4 sm:$0xff]   ;;  %v2119_v12 = vld [vmem:[#allocation3 + $0xd4] ss:$8 sps:$4 sm:$0xff]   ;;  %v2117_v14 = vld [vmem:[#allocation3 + $0xd0] ss:$8 sps:$4 sm:$0xff]  }
  0x32   :  { %1829 = vmatmul.mubr.msk.bf16.vlgmr.msra.gmra.mxu0 %vm212_vm0, %v73_v28  ;;  %1830 = vmatmul.mubr.msk.bf16.vlgmr.msra.gmra.mxu1 %vm212_vm0, %v73_v28  ;;  %v2122_v13 = vld [vmem:[#allocation3 + $0x1d4] ss:$8 sps:$4 sm:$0xff]   ;;  %v2120_v15 = vld [vmem:[#allocation3 + $0x1d0] ss:$8 sps:$4 sm:$0xff]   ;;  %v2125_v16 = vld [vmem:[#allocation3 + $0xc4] ss:$8 sps:$4 sm:$0xff]  }
  0x33   :  { %793 = vmatpush1.bf16.msra.mxu0 %v2057_v38  ;;  %834 = vmatpush1.bf16.msra.mxu1 %v2060_v39  ;;  %v2128_v17 = vld [vmem:[#allocation3 + $0x1c4] ss:$8 sps:$4 sm:$0xff]   ;;  %v2123_v18 = vld [vmem:[#allocation3 + $0xc0] ss:$8 sps:$4 sm:$0xff]   ;;  %v2131_v20 = vld [vmem:[#allocation3 + $0xb4] ss:$8 sps:$4 sm:$0xff]   ;;  %v92_v38 = vlaneseq }
  0x34   :  { %794 = vmatprep.subr.bf16.mxu0 %v2065_v40  ;;  %835 = vmatprep.subr.bf16.mxu1 %v2068_v41  ;;  %v2126_v19 = vld [vmem:[#allocation3 + $0x1c0] ss:$8 sps:$4 sm:$0xff]   ;;  %v2134_v21 = vld [vmem:[#allocation3 + $0x1b4] ss:$8 sps:$4 sm:$0xff]   ;;  %v2129_v22 = vld [vmem:[#allocation3 + $0xb0] ss:$8 sps:$4 sm:$0xff]  }
  0x35   :  { %v2132_v23 = vld [vmem:[#allocation3 + $0x1b0] ss:$8 sps:$4 sm:$0xff]   ;;  %v2137_v24 = vld [vmem:[#allocation3 + $0xa4] ss:$8 sps:$4 sm:$0xff]   ;;  %v2135_v26 = vld [vmem:[#allocation3 + $0xa0] ss:$8 sps:$4 sm:$0xff]  }
  0x36   :  { %v2140_v25 = vld [vmem:[#allocation3 + $0x1a4] ss:$8 sps:$4 sm:$0xff]   ;;  %v2138_v27 = vld [vmem:[#allocation3 + $0x1a0] ss:$8 sps:$4 sm:$0xff]   ;;  %v2143_v28 = vld [vmem:[#allocation3 + $0x94] ss:$8 sps:$4 sm:$0xff]  }
  0x37   :  { %795 = vmatpush1.bf16.msra.mxu0 %v2063_v42  ;;  %836 = vmatpush1.bf16.msra.mxu1 %v2066_v43  ;;  %v2146_v29 = vld [vmem:[#allocation3 + $0x194] ss:$8 sps:$4 sm:$0xff]   ;;  %v2141_v30 = vld [vmem:[#allocation3 + $0x90] ss:$8 sps:$4 sm:$0xff]   ;;  %v2149_v32 = vld [vmem:[#allocation3 + $0x84] ss:$8 sps:$4 sm:$0xff]  }
  0x38   :  { %796 = vmatprep.subr.bf16.mxu0 %v2071_v44  ;;  %837 = vmatprep.subr.bf16.mxu1 %v2074_v45  ;;  %v2144_v31 = vld [vmem:[#allocation3 + $0x190] ss:$8 sps:$4 sm:$0xff]   ;;  %v2152_v33 = vld [vmem:[#allocation3 + $0x184] ss:$8 sps:$4 sm:$0xff]   ;;  %v2147_v34 = vld [vmem:[#allocation3 + $0x80] ss:$8 sps:$4 sm:$0xff]  }
  0x39   :  { %v2150_v35 = vld [vmem:[#allocation3 + $0x180] ss:$8 sps:$4 sm:$0xff]   ;;  %v2155_v36 = vld [vmem:[#allocation5 + $0x74] ss:$8 sps:$4 sm:$0xff]   ;;  %v2469_v39 = vshrl.u32 %v92_v38, 7 }
  0x3a   :  { %v2201_v37 = vld [vmem:[%s2637_s6 + $0x78] sm:$0xff]   ;;  %v2477_v41 = vld [vmem:[%s2634_s3] sm:$0xff] }
  0x3b   :  { %797 = vmatpush1.bf16.msra.mxu0 %v2069_v46  ;;  %838 = vmatpush1.bf16.msra.mxu1 %v2072_v47  ;;  %v2472_v40 = vsub.s32 0, %v2469_v39  ;;  %v102_v42 = vsub.s32 2, %v2469_v39  ;;  %v2481_v43 = vsub.s32 1, %v2469_v39  ;;  %v106_v44 = vsub.s32 3, %v2469_v39  ;;  %v2168_v38 = vld [vmem:[#allocation5 + $0x20] ss:$8 sps:$4 sm:$0xff]  }
  0x3c   :  { %798 = vmatprep.subr.bf16.mxu0 %v2077_v48  ;;  %839 = vmatprep.subr.bf16.mxu1 %v2080_v49 }
  0x3d   :  { %v95_v45 = vrot.slane %v2477_v41, %v2472_v40  ;;  %v103_v46 = vrot.slane %v2477_v41, %v102_v42  ;;  %v99_v47 = vrot.slane %v2477_v41, %v2481_v43  ;;  %v107_v49 = vrot.slane %v2477_v41, %v106_v44  ;;  %v2173_v42 = vld [vmem:[#allocation5 + $0x14] ss:$8 sps:$4 sm:$0xff]   ;;  %v2171_v44 = vld [vmem:[#allocation5 + $0x10] ss:$8 sps:$4 sm:$0xff]  }
  0x3f   :  { %799 = vmatpush1.bf16.msra.mxu0 %v2075_v50  ;;  %840 = vmatpush1.bf16.msra.mxu1 %v2078_v51 }
  0x40   :  { %800 = vmatprep.subr.bf16.mxu0 %v2083_v52  ;;  %841 = vmatprep.subr.bf16.mxu1 %v2086_v53 }
  0x43   :  { %801 = vmatpush1.bf16.msra.mxu0 %v2081_v54  ;;  %842 = vmatpush1.bf16.msra.mxu1 %v2084_v55 }
  0x44   :  { %802 = vmatprep.subr.bf16.mxu0 %v2089_v56  ;;  %843 = vmatprep.subr.bf16.mxu1 %v2092_v57  ;;  %v114_v56 = vsub.s32 5, %v2469_v39 }
  0x47   :  { %803 = vmatpush1.bf16.msra.mxu0 %v2087_v58  ;;  %844 = vmatpush1.bf16.msra.mxu1 %v2090_v59 }
  0x48   :  { %804 = vmatprep.subr.bf16.mxu0 %v2095_v60  ;;  %845 = vmatprep.subr.bf16.mxu1 %v2098_v61 }
  0x4b   :  { %805 = vmatpush1.bf16.msra.mxu0 %v2093_v62  ;;  %846 = vmatpush1.bf16.msra.mxu1 %v2096_v63 }
  0x4c   :  { %806 = vmatprep.subr.bf16.mxu0 %v2101_v0  ;;  %847 = vmatprep.subr.bf16.mxu1 %v2104_v2 }
  0x4f   :  { %807 = vmatpush1.bf16.msra.mxu0 %v2099_v1  ;;  %848 = vmatpush1.bf16.msra.mxu1 %v2102_v3 }
  0x50   :  { %808 = vmatprep.subr.bf16.mxu0 %v2107_v4  ;;  %849 = vmatprep.subr.bf16.mxu1 %v2110_v5  ;;  %v115_v4 = vrot.slane %v2477_v41, %v114_v56  ;;  %v2202_v5 = vld [vmem:[%s2637_s6 + $0x38] sm:$0xff]   ;;  %v110_v56 = vsub.s32 4, %v2469_v39 }
  0x53   :  { %809 = vmatpush2.bf16.msra.mxu0 %v2105_v6  ;;  %850 = vmatpush2.bf16.msra.mxu1 %v2108_v7 }
  0x54   :  { %810 = vmatprep.subr.bf16.mxu0 %v2113_v8  ;;  %851 = vmatprep.subr.bf16.mxu1 %v2116_v9  ;;  %v2153_v8 = vld [vmem:[#allocation5 + $0x70] ss:$8 sps:$4 sm:$0xff]  }
  0x57   :  { %811 = vmatpush2.bf16.msra.mxu0 %v2111_v10  ;;  %852 = vmatpush2.bf16.msra.mxu1 %v2114_v11  ;;  %v2203_v10 = vld [vmem:[%s2637_s6 + $0x70] sm:$0xff]  }
  0x58   :  { %812 = vmatprep.subr.bf16.mxu0 %v2119_v12  ;;  %853 = vmatprep.subr.bf16.mxu1 %v2122_v13  ;;  %v2158_v11 = vld [vmem:[#allocation5 + $0x64] ss:$8 sps:$4 sm:$0xff]  }
  0x5b   :  { %813 = vmatpush2.bf16.msra.mxu0 %v2117_v14  ;;  %854 = vmatpush2.bf16.msra.mxu1 %v2120_v15 }
  0x5c   :  { %814 = vmatprep.subr.bf16.mxu0 %v2125_v16  ;;  %855 = vmatprep.subr.bf16.mxu1 %v2128_v17  ;;  %v2204_v16 = vld [vmem:[%s2637_s6 + $0x30] sm:$0xff]   ;;  %v2156_v17 = vld [vmem:[#allocation5 + $0x60] ss:$8 sps:$4 sm:$0xff]  }
  0x5f   :  { %815 = vmatpush2.bf16.msra.mxu0 %v2123_v18  ;;  %856 = vmatpush2.bf16.msra.mxu1 %v2126_v19  ;;  %v2205_v19 = vld [vmem:[%s2637_s6 + $0x68] sm:$0xff]  }
  0x60   :  { %816 = vmatprep.subr.bf16.mxu0 %v2131_v20  ;;  %857 = vmatprep.subr.bf16.mxu1 %v2134_v21  ;;  %v2161_v20 = vld [vmem:[#allocation5 + $0x54] ss:$8 sps:$4 sm:$0xff]  }
  0x63   :  { %817 = vmatpush2.bf16.msra.mxu0 %v2129_v22  ;;  %858 = vmatpush2.bf16.msra.mxu1 %v2132_v23 }
  0x64   :  { %818 = vmatprep.subr.bf16.mxu0 %v2137_v24  ;;  %859 = vmatprep.subr.bf16.mxu1 %v2140_v25 }
  0x67   :  { %819 = vmatpush2.bf16.msra.mxu0 %v2135_v26  ;;  %860 = vmatpush2.bf16.msra.mxu1 %v2138_v27  ;;  %v2206_v26 = vld [vmem:[%s2637_s6 + $0x28] sm:$0xff]   ;;  %v2159_v27 = vld [vmem:[#allocation5 + $0x50] ss:$8 sps:$4 sm:$0xff]  }
  0x68   :  { %820 = vmatprep.subr.bf16.mxu0 %v2143_v28  ;;  %861 = vmatprep.subr.bf16.mxu1 %v2146_v29  ;;  %v2207_v28 = vld [vmem:[%s2637_s6 + $0x60] sm:$0xff]  }
  0x69   :  { %v2164_v29 = vld [vmem:[#allocation5 + $0x44] ss:$8 sps:$4 sm:$0xff]  }
  0x6b   :  { %821 = vmatpush2.bf16.msra.mxu0 %v2141_v30  ;;  %862 = vmatpush2.bf16.msra.mxu1 %v2144_v31  ;;  %v2208_v30 = vld [vmem:[%s2637_s6 + $0x20] sm:$0xff]  }
  0x6c   :  { %822 = vmatprep.subr.bf16.mxu0 %v2149_v32  ;;  %863 = vmatprep.subr.bf16.mxu1 %v2152_v33  ;;  %v2162_v31 = vld [vmem:[#allocation5 + $0x40] ss:$8 sps:$4 sm:$0xff]   ;;  %v2209_v32 = vld [vmem:[%s2637_s6 + $0x58] sm:$0xff]  }
  0x6d   :  { %v2167_v33 = vld [vmem:[#allocation5 + $0x34] ss:$8 sps:$4 sm:$0xff]  }
  0x6f   :  { %823 = vmatpush2.bf16.msra.mxu0 %v2147_v34  ;;  %864 = vmatpush2.bf16.msra.mxu1 %v2150_v35  ;;  %v2210_v34 = vld [vmem:[%s2637_s6 + $0x18] sm:$0xff]  }
  0x70   :  { %1449 = vmatprep.subr.bf16.mxu1 %v2155_v36  ;;  %1995 = vmatprep.subr.bf16.mxu0 %v2201_v37  ;;  %v2165_v35 = vld [vmem:[#allocation5 + $0x30] ss:$8 sps:$4 sm:$0xff]   ;;  %v2170_v37 = vld [vmem:[#allocation5 + $0x24] ss:$8 sps:$4 sm:$0xff]  }
  0x71   :  { %v2211_v36 = vld [vmem:[%s2637_s6 + $0x50] sm:$0xff]  }
  0xea   :  { %v250_v48 = vpop.f32.mrf.mxu0  ;;  %v291_v51 = vpop.f32.mrf.mxu1 }
  0xeb   :  { %v251_v50 = vadd.f32 %v250_v48, %v95_v45  ;;  %v292_v52 = vadd.f32 %v291_v51, %v103_v46  ;;  %v2176_v45 = vld [vmem:[#allocation5 + $0x4] ss:$8 sps:$4 sm:$0xff]   ;;  %v2174_v46 = vld [vmem:[#allocation5] ss:$8 sps:$4 sm:$0xff]   ;;  %v2177_v48 = vld [vmem:[#allocation5 + $0xf0] ss:$8 sps:$4 sm:$0xff]  }
  0xec   :  { %v252_v53 = vpop.f32.mrf.mxu0  ;;  %v293_v55 = vpop.f32.mrf.mxu1  ;;  %v2185_v51 = vld [vmem:[#allocation5 + $0xd4] ss:$8 sps:$4 sm:$0xff]  }
  0xed   :  { %v253_v54 = vadd.f32 %v252_v53, %v99_v47  ;;  %v380_v57 = vmax.f32 %v251_v50, 0.0  ;;  %v382_v58 = vmax.f32 %v292_v52, 0.0  ;;  %v294_v59 = vadd.f32 %v293_v55, %v107_v49  ;;  %v2179_v47 = vld [vmem:[#allocation5 + $0xf4] ss:$8 sps:$4 sm:$0xff]   ;;  %v2182_v49 = vld [vmem:[#allocation5 + $0xe4] ss:$8 sps:$4 sm:$0xff]  }
  0xee   :  { %v254_v60 = vpop.f32.mrf.mxu0  ;;  %v295_v62 = vpop.f32.mrf.mxu1  ;;  %v2180_v50 = vld [vmem:[#allocation5 + $0xe0] ss:$8 sps:$4 sm:$0xff]   ;;  %v2183_v52 = vld [vmem:[#allocation5 + $0xd0] ss:$8 sps:$4 sm:$0xff]   ;;  %v2188_v53 = vld [vmem:[#allocation5 + $0xc4] ss:$8 sps:$4 sm:$0xff]  }
  0xef   :  { %v381_v61 = vmax.f32 %v253_v54, 0.0  ;;  %v383_v63 = vmax.f32 %v294_v59, 0.0  ;;  %v390_v1 = vpack.c.bf16 %v382_v58, %v382_v58  ;;  %v388_v6 = vpack.c.bf16 %v380_v57, %v380_v57  ;;  %v2186_v54 = vld [vmem:[#allocation5 + $0xc0] ss:$8 sps:$4 sm:$0xff]   ;;  %v2191_v55 = vld [vmem:[#allocation5 + $0xb4] ss:$8 sps:$4 sm:$0xff]  }
  0xf0   :  { %v255_v0 = vpop.f32.mrf.mxu0  ;;  %v296_v3 = vpop.f32.mrf.mxu1  ;;  %v2189_v57 = vld [vmem:[#allocation5 + $0xb0] ss:$8 sps:$4 sm:$0xff]   ;;  %v2194_v58 = vld [vmem:[#allocation5 + $0xa4] ss:$8 sps:$4 sm:$0xff]   ;;  %v111_v59 = vrot.slane %v2477_v41, %v110_v56  ;;  %v2192_v60 = vld [vmem:[#allocation5 + $0xa0] ss:$8 sps:$4 sm:$0xff]  }
  0xf1   :  { %v389_v2 = vpack.c.bf16 %v381_v61, %v381_v61  ;;  %v391_v7 = vpack.c.bf16 %v383_v63, %v383_v63  ;;  %v2197_v61 = vld [vmem:[#allocation5 + $0x94] ss:$8 sps:$4 sm:$0xff]   ;;  %v2195_v63 = vld [vmem:[#allocation5 + $0x90] ss:$8 sps:$4 sm:$0xff]   ;;  %v2200_v0 = vld [vmem:[#allocation5 + $0x84] ss:$8 sps:$4 sm:$0xff]  }
  0xf2   :  { %v2495_v9 = vpop.f32.mrf.mxu0  ;;  %v2500_v12 = vpop.f32.mrf.mxu1  ;;  %v2246_v56 = vld [vmem:[#allocation5 + $0x1e4] ss:$8 sps:$4 sm:$0xff]  }
  0xf3   :  { %824 = vmatprep.mubr.bf16.mxu0 %v389_v2  ;;  %865 = vmatprep.mubr.bf16.mxu1 %v391_v7  ;;  %v333_v62 = vadd.f32 %v2495_v9, %v111_v59  ;;  %v2198_v2 = vld [vmem:[#allocation5 + $0x80] ss:$8 sps:$4 sm:$0xff]   ;;  %v2219_v9 = vld [vmem:[#allocation5 + $0x174] ss:$8 sps:$4 sm:$0xff]   ;;  %v2247_v59 = vld [vmem:[#allocation5 + $0x1d0] ss:$8 sps:$4 sm:$0xff]  }
  0xf4   :  { %825 = vmatmul.mubr.bf16.vlgmr.msra.gmra.mxu0 %v388_v6  ;;  %v334_v13 = vpop.f32.mrf.mxu0  ;;  %866 = vmatmul.mubr.bf16.vlgmr.msra.gmra.mxu1 %v390_v1  ;;  %v2502_v15 = vpop.f32.mrf.mxu1  ;;  %v2214_v6 = vld [vmem:[%s2637_s6 + $0x8] sm:$0xff]   ;;  %v2215_v7 = vld [vmem:[%s2637_s6 + $0x40] sm:$0xff]  }
  0xf5   :  { %v335_v14 = vadd.f32 %v334_v13, %v115_v4  ;;  %1996 = vmatpush3.bf16.msra.mxu0 %v2202_v5  ;;  %1450 = vmatpush1.bf16.msra.mxu1 %v2153_v8  ;;  %v384_v1 = vmax.f32 %v333_v62, 0.0  ;;  %v2212_v4 = vld [vmem:[%s2637_s6 + $0x10] sm:$0xff]   ;;  %v2213_v5 = vld [vmem:[%s2637_s6 + $0x48] sm:$0xff]   ;;  %v2216_v8 = vld [vmem:[%s2637_s6] sm:$0xff]  }
  0xf6   :  { %v336_v18 = vpop.f32.mrf.mxu0  ;;  %1997 = vmatprep.subr.bf16.mxu0 %v2203_v10  ;;  %1451 = vmatprep.subr.bf16.mxu1 %v2158_v11  ;;  %v377_v22 = vpop.f32.mrf.mxu1  ;;  %v460_v10 = vld [vmem:[%s2636_s5] sm:$0x3]  ;;  %v122_v11 = vsub.s32 7, %v2469_v39 }
  0xf7   :  { %v385_v21 = vmax.f32 %v335_v14, 0.0  ;;  %v392_v3 = vpack.c.bf16 %v384_v1, %v384_v1  ;;  %v465_v13 = vrot.slane %v460_v10, %v2472_v40  ;;  %v2255_v62 = vld [vmem:[#allocation5 + $0x1b4] ss:$8 sps:$4 sm:$0xff]   ;;  %v2258_v1 = vld [vmem:[#allocation5 + $0x1a4] ss:$8 sps:$4 sm:$0xff]  }
  0xf8   :  { %v337_v23 = vpop.f32.mrf.mxu0  ;;  %v378_v25 = vpop.f32.mrf.mxu1  ;;  %v123_v14 = vrot.slane %v2477_v41, %v122_v11 }
  0xf9   :  { %v393_v24 = vpack.c.bf16 %v385_v21, %v385_v21  ;;  %1998 = vmatpush3.bf16.msra.mxu0 %v2204_v16  ;;  %1452 = vmatpush1.bf16.msra.mxu1 %v2156_v17  ;;  %v469_v16 = vrot.slane %v460_v10, %v2481_v43 }
  0xfa   :  { %1999 = vmatprep.subr.bf16.mxu0 %v2205_v19  ;;  %1453 = vmatprep.subr.bf16.mxu1 %v2161_v20  ;;  %v376_v21 = vadd.f32 %v2502_v15, %v123_v14  ;;  %v2220_v15 = vld [vmem:[#allocation5 + $0x160] ss:$8 sps:$4 sm:$0xff]   ;;  %v2265_v14 = vld [vmem:[%s2641_s10 + $0x78] sm:$0xff]  }
  0xfb   :  { %1481 = vmatprep.mubr.bf16.mxu1 %v393_v24 }
  0xfd   :  { %2000 = vmatpush3.bf16.msra.mxu0 %v2206_v26  ;;  %1454 = vmatpush1.bf16.msra.mxu1 %v2159_v27 }
  0xfe   :  { %2001 = vmatprep.subr.bf16.mxu0 %v2207_v28  ;;  %1455 = vmatprep.subr.bf16.mxu1 %v2164_v29 }
 0x101   :  { %2002 = vmatpush3.bf16.msra.mxu0 %v2208_v30  ;;  %1456 = vmatpush1.bf16.msra.mxu1 %v2162_v31  ;;  %v387_v30 = vmax.f32 %v376_v21, 0.0  ;;  %v2272_v21 = vld [vmem:[%s2641_s10 + $0x20] sm:$0xff]  }
 0x102   :  { %2003 = vmatprep.subr.bf16.mxu0 %v2209_v32  ;;  %1457 = vmatprep.subr.bf16.mxu1 %v2167_v33 }
 0x105   :  { %2004 = vmatpush3.bf16.msra.mxu0 %v2210_v34  ;;  %1458 = vmatpush1.bf16.msra.mxu1 %v2165_v35  ;;  %v2217_v34 = vld [vmem:[#allocation5 + $0x170] ss:$8 sps:$4 sm:$0xff]  }
 0x106   :  { %2005 = vmatprep.subr.bf16.mxu0 %v2211_v36  ;;  %1459 = vmatprep.subr.bf16.mxu1 %v2170_v37  ;;  %v2222_v36 = vld [vmem:[#allocation5 + $0x164] ss:$8 sps:$4 sm:$0xff]   ;;  %v395_v37 = vpack.c.bf16 %v387_v30, %v387_v30 }
 0x109   :  { %1460 = vmatpush1.bf16.msra.mxu1 %v2168_v38  ;;  %2006 = vmatpush3.bf16.msra.mxu0 %v2212_v4  ;;  %v2225_v38 = vld [vmem:[#allocation5 + $0x154] ss:$8 sps:$4 sm:$0xff]  }
 0x10a   :  { %1461 = vmatprep.subr.bf16.mxu1 %v2173_v42  ;;  %2007 = vmatprep.subr.bf16.mxu0 %v2213_v5  ;;  %v2223_v42 = vld [vmem:[#allocation5 + $0x150] ss:$8 sps:$4 sm:$0xff]   ;;  %v2261_v4 = vld [vmem:[#allocation5 + $0x194] ss:$8 sps:$4 sm:$0xff]  }
 0x10b   :  { %v2259_v5 = vld [vmem:[#allocation5 + $0x190] ss:$8 sps:$4 sm:$0xff]  }
 0x10d   :  { %1462 = vmatpush1.bf16.msra.mxu1 %v2171_v44  ;;  %2008 = vmatpush3.bf16.msra.mxu0 %v2214_v6  ;;  %v2228_v44 = vld [vmem:[#allocation5 + $0x144] ss:$8 sps:$4 sm:$0xff]  }
 0x10e   :  { %1463 = vmatprep.subr.bf16.mxu1 %v2176_v45  ;;  %2009 = vmatprep.subr.bf16.mxu0 %v2215_v7  ;;  %v2226_v45 = vld [vmem:[#allocation5 + $0x140] ss:$8 sps:$4 sm:$0xff]  }
 0x111   :  { %1464 = vmatpush1.bf16.msra.mxu1 %v2174_v46  ;;  %2010 = vmatpush3.bf16.msra.mxu0 %v2216_v8  ;;  %v2231_v46 = vld [vmem:[#allocation5 + $0x134] ss:$8 sps:$4 sm:$0xff]   ;;  %v2264_v8 = vld [vmem:[#allocation5 + $0x184] ss:$8 sps:$4 sm:$0xff]  }
 0x112   :  { %1465 = vmatprep.subr.bf16.mxu1 %v2179_v47  ;;  %1490 = vmatprep.subr.bf16.mxu0 %v2219_v9  ;;  %v2229_v47 = vld [vmem:[#allocation5 + $0x130] ss:$8 sps:$4 sm:$0xff]  }
 0x115   :  { %1466 = vmatpush2.bf16.msra.mxu1 %v2177_v48  ;;  %v2234_v48 = vld [vmem:[#allocation5 + $0x124] ss:$8 sps:$4 sm:$0xff]  }
 0x116   :  { %1467 = vmatprep.subr.bf16.mxu1 %v2182_v49  ;;  %v2232_v49 = vld [vmem:[#allocation5 + $0x120] ss:$8 sps:$4 sm:$0xff]  }
 0x119   :  { %1468 = vmatpush2.bf16.msra.mxu1 %v2180_v50  ;;  %v2237_v50 = vld [vmem:[#allocation5 + $0x114] ss:$8 sps:$4 sm:$0xff]  }
 0x11a   :  { %1469 = vmatprep.subr.bf16.mxu1 %v2185_v51  ;;  %v2235_v51 = vld [vmem:[#allocation5 + $0x110] ss:$8 sps:$4 sm:$0xff]  }
 0x11d   :  { %1470 = vmatpush2.bf16.msra.mxu1 %v2183_v52  ;;  %v2240_v52 = vld [vmem:[#allocation5 + $0x104] ss:$8 sps:$4 sm:$0xff]  }
 0x11e   :  { %1471 = vmatprep.subr.bf16.mxu1 %v2188_v53  ;;  %v2238_v53 = vld [vmem:[#allocation5 + $0x100] ss:$8 sps:$4 sm:$0xff]  }
 0x121   :  { %1472 = vmatpush2.bf16.msra.mxu1 %v2186_v54  ;;  %v2243_v54 = vld [vmem:[#allocation5 + $0x1f4] ss:$8 sps:$4 sm:$0xff]  }
 0x122   :  { %1473 = vmatprep.subr.bf16.mxu1 %v2191_v55  ;;  %v2241_v55 = vld [vmem:[#allocation5 + $0x1f0] ss:$8 sps:$4 sm:$0xff]  }
 0x125   :  { %1474 = vmatpush2.bf16.msra.mxu1 %v2189_v57  ;;  %v2244_v57 = vld [vmem:[#allocation5 + $0x1e0] ss:$8 sps:$4 sm:$0xff]  }
 0x126   :  { %1475 = vmatprep.subr.bf16.mxu1 %v2194_v58  ;;  %v2249_v58 = vld [vmem:[#allocation5 + $0x1d4] ss:$8 sps:$4 sm:$0xff]  }
 0x129   :  { %1476 = vmatpush2.bf16.msra.mxu1 %v2192_v60  ;;  %v2252_v60 = vld [vmem:[#allocation5 + $0x1c4] ss:$8 sps:$4 sm:$0xff]  }
 0x12a   :  { %1477 = vmatprep.subr.bf16.mxu1 %v2197_v61  ;;  %v2250_v61 = vld [vmem:[#allocation5 + $0x1c0] ss:$8 sps:$4 sm:$0xff]  }
 0x12d   :  { %1478 = vmatpush2.bf16.msra.mxu1 %v2195_v63  ;;  %v2253_v63 = vld [vmem:[#allocation5 + $0x1b0] ss:$8 sps:$4 sm:$0xff]  }
 0x12e   :  { %1479 = vmatprep.subr.bf16.mxu1 %v2200_v0  ;;  %v118_v0 = vsub.s32 6, %v2469_v39  ;;  %v2262_v39 = vld [vmem:[#allocation5 + $0x180] ss:$8 sps:$4 sm:$0xff]  }
 0x131   :  { %1480 = vmatpush2.bf16.msra.mxu1 %v2198_v2  ;;  %v2256_v2 = vld [vmem:[#allocation5 + $0x1a0] ss:$8 sps:$4 sm:$0xff]  }
 0x132   :  { %2017 = vmatprep.subr.bf16.mxu1 %v2265_v14 }
 0x134   :  { %1482 = vmatmul.mubr.bf16.vlgmr.msra.gmra.mxu1 %v392_v3  ;;  %v119_v3 = vrot.slane %v2477_v41, %v118_v0 }
 0x136   :  { %v374_v7 = vadd.f32 %v2500_v12, %v119_v3  ;;  %v2266_v12 = vld [vmem:[%s2641_s10 + $0x38] sm:$0xff]  }
 0x137   :  { %2018 = vmatpush3.bf16.msra.mxu1 %v2266_v12 }
 0x138   :  { %v386_v11 = vmax.f32 %v374_v7, 0.0 }
 0x13a   :  { %v394_v41 = vpack.c.bf16 %v386_v11, %v386_v11 }
 0x1b4   :  { %v826_v17 = vpop.f32.mrf.mxu0  ;;  %v867_v19 = vpop.f32.mrf.mxu1 }
 0x1b5   :  { %v827_v18 = vadd.f32 %v826_v17, %v465_v13  ;;  %v2268_v17 = vld [vmem:[%s2641_s10 + $0x30] sm:$0xff]  }
 0x1b6   :  { %v828_v20 = vpop.f32.mrf.mxu0  ;;  %v869_v24 = vpop.f32.mrf.mxu1 }
 0x1b7   :  { %v868_v22 = vadd.f32 %v867_v19, %v827_v18  ;;  %v829_v23 = vadd.f32 %v828_v20, %v469_v16  ;;  %v2267_v16 = vld [vmem:[%s2641_s10 + $0x70] sm:$0xff]   ;;  %v2269_v18 = vld [vmem:[%s2641_s10 + $0x68] sm:$0xff]   ;;  %v2271_v20 = vld [vmem:[%s2641_s10 + $0x60] sm:$0xff]  }
 0x1b8   :  { %v830_v25 = vpop.f32.mrf.mxu0  ;;  %v871_v27 = vpop.f32.mrf.mxu1  ;;  %2019 = vmatprep.subr.bf16.mxu1 %v2267_v16  ;;  %v2270_v19 = vld [vmem:[%s2641_s10 + $0x28] sm:$0xff]  }
 0x1b9   :  { %v870_v26 = vadd.f32 %v869_v24, %v829_v23  ;;  %v874_v28 = vmax.f32 %v868_v22, 0.0  ;;  %2020 = vmatpush3.bf16.msra.mxu1 %v2268_v17  ;;  %v2273_v22 = vld [vmem:[%s2641_s10 + $0x58] sm:$0xff]   ;;  %v2275_v24 = vld [vmem:[%s2641_s10 + $0x50] sm:$0xff]   ;;  %v2278_v27 = vld [vmem:[%s2641_s10 + $0x8] sm:$0xff]  }
 0x1ba   :  { %v831_v29 = vpop.f32.mrf.mxu0  ;;  %v872_v32 = vpop.f32.mrf.mxu1  ;;  %2021 = vmatprep.subr.bf16.mxu1 %v2269_v18  ;;  %v2274_v23 = vld [vmem:[%s2641_s10 + $0x18] sm:$0xff]   ;;  %v2276_v25 = vld [vmem:[%s2641_s10 + $0x10] sm:$0xff]  }
 0x1bb   :  { %v875_v31 = vmax.f32 %v870_v26, 0.0  ;;  %v876_v35 = vpack.c.bf16 %v874_v28, %v874_v28  ;;  %v2277_v26 = vld [vmem:[%s2641_s10 + $0x48] sm:$0xff]   ;;  %v2279_v28 = vld [vmem:[%s2641_s10 + $0x40] sm:$0xff]  }
 0x1bc   :  { %v2280_v29 = vld [vmem:[%s2641_s10] sm:$0xff]  }
 0x1bd   :  { %v877_v33 = vpack.c.bf16 %v875_v31, %v875_v31  ;;  %2022 = vmatpush3.bf16.msra.mxu1 %v2270_v19  ;;  %v1895_v32 = vld [vmem:[%s2638_s7] ss:$0 sm:$0xff] }
 0x1be   :  { %2023 = vmatprep.subr.bf16.mxu1 %v2271_v20 }
 0x1bf   :  { %1045 = vmatprep.mubr.bf16.mxu0 %v877_v33 }
 0x1c0   :  { %1046 = vmatmul.mubr.bf16.vlgmr.msra.gmra.mxu0 %v876_v35 }
 0x1c1   :  { %1491 = vmatpush1.bf16.msra.mxu0 %v2217_v34  ;;  %1522 = vmatprep.mubr.bf16.mxu0 %v395_v37 }
 0x1c2   :  { %1492 = vmatprep.subr.bf16.mxu0 %v2222_v36  ;;  %2024 = vmatpush3.bf16.msra.mxu1 %v2272_v21 }
 0x1c3   :  { %2025 = vmatprep.subr.bf16.mxu1 %v2273_v22 }
 0x1c5   :  { %1493 = vmatpush1.bf16.msra.mxu0 %v2220_v15  ;;  %v1718_v15 = vld [vmem:[%s2632_s1 + $0x8] sm:$0x1] }
 0x1c6   :  { %1494 = vmatprep.subr.bf16.mxu0 %v2225_v38  ;;  %2026 = vmatpush3.bf16.msra.mxu1 %v2274_v23  ;;  %v2334_v38 = vmov 0.0  }
 0x1c7   :  { %2027 = vmatprep.subr.bf16.mxu1 %v2275_v24 }
 0x1c9   :  { %1495 = vmatpush1.bf16.msra.mxu0 %v2223_v42  ;;  %v1717_v42 = vld [vmem:[%s2632_s1] sm:$0xff]  ;;  %s2336_s1 = smov 9  }
 0x1ca   :  { %1496 = vmatprep.subr.bf16.mxu0 %v2228_v44  ;;  %2028 = vmatpush3.bf16.msra.mxu1 %v2276_v25  ;;  %v1117_v44 = vld [vmem:[%s2640_s9] sm:$0x3] }
 0x1cb   :  { %2029 = vmatprep.subr.bf16.mxu1 %v2277_v26 }
 0x1cd   :  { %1497 = vmatpush1.bf16.msra.mxu0 %v2226_v45  ;;  %v1122_v45 = vrot.slane %v1117_v44, %v2472_v40 }
 0x1ce   :  { %1498 = vmatprep.subr.bf16.mxu0 %v2231_v46  ;;  %2030 = vmatpush3.bf16.msra.mxu1 %v2278_v27  ;;  %v1126_v46 = vrot.slane %v1117_v44, %v2481_v43 }
 0x1cf   :  { %2031 = vmatprep.subr.bf16.mxu1 %v2279_v28 }
 0x1d1   :  { %1499 = vmatpush1.bf16.msra.mxu0 %v2229_v47 }
 0x1d2   :  { %1500 = vmatprep.subr.bf16.mxu0 %v2234_v48  ;;  %2032 = vmatpush3.bf16.msra.mxu1 %v2280_v29 }
 0x1d5   :  { %1501 = vmatpush1.bf16.msra.mxu0 %v2232_v49 }
 0x1d6   :  { %1502 = vmatprep.subr.bf16.mxu0 %v2237_v50 }
 0x1d9   :  { %1503 = vmatpush1.bf16.msra.mxu0 %v2235_v51 }
 0x1da   :  { %1504 = vmatprep.subr.bf16.mxu0 %v2240_v52 }
 0x1dd   :  { %1505 = vmatpush1.bf16.msra.mxu0 %v2238_v53 }
 0x1de   :  { %1506 = vmatprep.subr.bf16.mxu0 %v2243_v54 }
 0x1e1   :  { %1507 = vmatpush2.bf16.msra.mxu0 %v2241_v55 }
 0x1e2   :  { %1508 = vmatprep.subr.bf16.mxu0 %v2246_v56 }
 0x1e5   :  { %1509 = vmatpush2.bf16.msra.mxu0 %v2244_v57 }
 0x1e6   :  { %1510 = vmatprep.subr.bf16.mxu0 %v2249_v58 }
 0x1e9   :  { %1511 = vmatpush2.bf16.msra.mxu0 %v2247_v59 }
 0x1ea   :  { %1512 = vmatprep.subr.bf16.mxu0 %v2252_v60 }
 0x1ed   :  { %1513 = vmatpush2.bf16.msra.mxu0 %v2250_v61 }
 0x1ee   :  { %1514 = vmatprep.subr.bf16.mxu0 %v2255_v62  ;;  %v1976_v62 = vld [vmem:[#allocation2] ss:$0 sm:$0xff] }
 0x1f1   :  { %1515 = vmatpush2.bf16.msra.mxu0 %v2253_v63 }
 0x1f2   :  { %1516 = vmatprep.subr.bf16.mxu0 %v2258_v1 }
 0x1f4   :  { %v2556_v6 = vpop.f32.mrf.mxu1 }
 0x1f5   :  { %1517 = vmatpush2.bf16.msra.mxu0 %v2256_v2  ;;  %v1484_v47 = vadd.f32 %v2556_v6, %v1122_v45 }
 0x1f6   :  { %1518 = vmatprep.subr.bf16.mxu0 %v2261_v4  ;;  %v2559_v9 = vpop.f32.mrf.mxu1 }
 0x1f7   :  { %v1486_v49 = vadd.f32 %v2559_v9, %v1126_v46 }
 0x1f8   :  { %v1487_v10 = vpop.f32.mrf.mxu1 }
 0x1f9   :  { %1519 = vmatpush2.bf16.msra.mxu0 %v2259_v5 }
 0x1fa   :  { %1520 = vmatprep.subr.bf16.mxu0 %v2264_v8  ;;  %v1488_v13 = vpop.f32.mrf.mxu1 }
 0x1fd   :  { %1521 = vmatpush2.bf16.msra.mxu0 %v2262_v39 }
 0x1fe   :  { %2042 = vmatprep.subr.mxu0 %v2334_v38 }
 0x200   :  { %1523 = vmatmul.mubr.bf16.vlgmr.msra.gmra.mxu0 %v394_v41 }
 0x201   :  { %2046 = vmatprep.mubr.msk.f32.mxu0 %vm2335_vm3, %v2334_v38  ;;  %2043 = vmatpush3.msk.msra.mxu0 %vm1722_vm2, %v1718_v15 }
 0x202   :  { %2044 = vmatprep.subr.mxu0 %v2334_v38 }
 0x203   :  { %2045 = vmatpush3.msra.mxu0 %v1717_v42 }
 0x280   :  { %v2011_v30 = vpop.f32.mrf.mxu0 }
 0x282   :  { %v2012_v31 = vpop.f32.mrf.mxu0 }
 0x283   :  { %v2013_v33 = vadd.f32 %v2012_v31, %v2011_v30 }
 0x284   :  { %v2014_v34 = vpop.f32.mrf.mxu0 }
 0x285   :  { %v1048_v35 = vadd.f32 %v2013_v33, %v1895_v32 }
 0x286   :  { %v2015_v36 = vpop.f32.mrf.mxu0 }
 0x287   :  { %v1711_v37 = vsel %vm1710_vm1, %v1048_v35, -inf }
 0x288   :  { %1712 = vmax.xlane.f32.xlu0 %v1711_v37 }
 0x2c0   :  { %v1524_v48 = vpop.f32.mrf.mxu0 }
 0x2c1   :  { %v1525_v50 = vadd.f32 %v1524_v48, %v1484_v47 }
 0x2c2   :  { %v1526_v51 = vpop.f32.mrf.mxu0 }
 0x2c3   :  { %v1527_v52 = vadd.f32 %v1526_v51, %v1486_v49  ;;  %v1531_v53 = vmax.f32 %v1525_v50, 0.0 }
 0x2c4   :  { %v1528_v54 = vpop.f32.mrf.mxu0 }
 0x2c5   :  { %v1532_v55 = vmax.f32 %v1527_v52, 0.0  ;;  %v1533_v58 = vpack.c.bf16 %v1531_v53, %v1531_v53 }
 0x2c6   :  { %v1529_v56 = vpop.f32.mrf.mxu0 }
 0x2c7   :  { %v1534_v57 = vpack.c.bf16 %v1532_v55, %v1532_v55 }
 0x2c9   :  { %1702 = vmatprep.mubr.bf16.mxu1 %v1534_v57 }
 0x2ca   :  { %1703 = vmatmul.mubr.bf16.vlgmr.msra.gmra.mxu1 %v1533_v58 }
 0x311   :  { %v1713_v59 = vpop.xlane.xlu0 %1712 }
 0x312   :  { %v1714_v40 = vsub.f32 %v1048_v35, %v1713_v59 }
 0x314   :  { %v1715_v60 = vmul.f32 1.442695, %v1714_v40 }
 0x316   :  { %2281 = vpow2.f32 %v1715_v60 }
 0x323   :  { %v2282_v43 = vpop.eup %2281 }
 0x324   :  { %2047 = vmatmul.mubr.msk.f32.vlgmr.msra.gmra.mxu0 %vm1710_vm1, %v2282_v43 }
 0x38a   :  { %v2033_v61 = vpop.f32.mrf.mxu1 }
 0x38c   :  { %v2034_v63 = vpop.f32.mrf.mxu1 }
 0x38d   :  { %v2035_v0 = vadd.f32 %v2034_v63, %v2033_v61 }
 0x38e   :  { %v2036_v1 = vpop.f32.mrf.mxu1 }
 0x38f   :  { %v1705_v2 = vadd.f32 %v2035_v0, %v1976_v62 }
 0x390   :  { %v2037_v3 = vpop.f32.mrf.mxu1 }
 0x391   :  { %1799 = vrot.lane.b32.xlu0 %v1705_v2, %s2336_s1 }
 0x3e4   :  { %v1792_v4 = vpop.f32.mrf.mxu0 }
 0x3e5   :  { %2283 = vrcp.f32 %v1792_v4 }
 0x3e6   :  { %v2048_v5 = vpop.f32.mrf.mxu0 }
 0x3f2   :  { %v2284_v6 = vpop.eup %2283 }
 0x3f3   :  { %v1797_v7 = vmul.f32 %v2284_v6, %v2282_v43 }
 0x403   :  { %v1800_v8 = vpop.permute.xlu0 %1799 }
 0x404   :  { %v1802_v9 = vsel %vm1710_vm1, %v1797_v7, %v1800_v8 }
 0x405   :  { %1804 = vst.msk [vmem:[%s2643_s12] sm:$0xff] %vm1803_vm4, %v1802_v9 }
 0x406   :  { %1809 = vsyncpa [#allocation4], 1 }
 0x407   :  { %1810 = vsyncpa [#allocation6], 1 }

</bundles_post_ra>
